<compile_context>
chip_gen: v5e
topology: v5e:2x2
jax: 0.10.0
libtpu: 0.0.40
codegen_flags: <defaults>
</compile_context>

<pallas_src>
from functools import partial

import jax
import jax.numpy as jnp
from jax.experimental import pallas as pl
from jax.experimental.pallas import tpu as pltpu


# ---------------------------------------------------------------------------
# Kernels
# ---------------------------------------------------------------------------

def _pool_kernel(x_ref, sum_ref, *, inv_hw):
    """Accumulate spatial sums per row; scale by 1/HW on the last HW tile."""
    j = pl.program_id(1)

    @pl.when(j == 0)
    def _init():
        sum_ref[...] = jnp.zeros_like(sum_ref)

    x = x_ref[...].astype(jnp.float32)                     # (rt, ht) tile
    sum_ref[...] += jnp.sum(x, axis=-1, keepdims=True)     # (rt, 1)

    @pl.when(j == pl.num_programs(1) - 1)
    def _finalize():
        sum_ref[...] *= inv_hw                             # single scale at end


def _scale_kernel(x_ref, g_ref, o_ref):
    """Elementwise rescale: out = x * gate(row), in x's native dtype."""
    x = x_ref[...]                                         # (rt, ht) native dtype
    g = g_ref[...]                                         # (rt, 1)  f32
    o_ref[...] = (x.astype(jnp.float32) * g).astype(o_ref.dtype)


# ---------------------------------------------------------------------------
# Wrapper
# ---------------------------------------------------------------------------

def _pick_tile(n, target, align):
    """Largest divisor of n that is a multiple of `align` and <= target,
    else n itself (a full-extent block is always legal)."""
    if n <= target:
        return n
    for d in range(target, 0, -1):
        if n % d == 0 and d % align == 0:
            return d
    return n


def eca_forward(x, conv_weight, k_size=3):
    """x: (B, C, H, W) in any float dtype ; conv_weight: (1, 1, k_size)."""
    assert k_size % 2 == 1, "ECA uses an odd kernel size"
    B, C, H, W = x.shape
    R = B * C
    HW = H * W

    xf = x.reshape(R, HW)                    # lane-dense 2-D view, NATIVE dtype

    # Tile sizes: keep per-block footprint small enough for double-buffered
    # VMEM on all generations (v7x has only 64 MiB physical / 32 MiB default).
    rt = _pick_tile(R, target=256, align=8)
    ht = _pick_tile(HW, target=2048, align=128)
    grid = (R // rt, HW // ht)

    # ---- Pass 1: global average pool (spatial mean per (b, c) row) ---------
    pooled = pl.pallas_call(
        partial(_pool_kernel, inv_hw=1.0 / float(HW)),
        out_shape=jax.ShapeDtypeStruct((R, 1), jnp.float32),
        grid=grid,
        in_specs=[pl.BlockSpec((rt, ht), lambda i, j: (i, j))],
        out_specs=pl.BlockSpec((rt, 1), lambda i, j: (i, 0)),
        compiler_params=pltpu.CompilerParams(
            dimension_semantics=("parallel", "arbitrary")),
    )(xf)

    # ---- Tiny channel conv + sigmoid in plain JAX (O(B*C) work) ------------
    # PyTorch Conv1d(1, 1, k, padding=(k-1)//2, bias=False) == cross-correlation.
    pad = (k_size - 1) // 2
    w = conv_weight.reshape(-1).astype(jnp.float32)        # (k_size,)
    y = pooled.reshape(B, C)                               # (B, C) f32
    ypad = jnp.pad(y, ((0, 0), (pad, pad)))                # (B, C + 2*pad)
    conv = sum(w[j] * ypad[:, j:j + C] for j in range(k_size))
    gate = jax.nn.sigmoid(conv).reshape(R, 1)              # (R, 1) f32

    # ---- Pass 2: elementwise rescale, tiled & pipelined ---------------------
    # TODO(synk): enable input_output_aliases={0: 0} when the caller donates x
    # (in-place rescale); skipped here because the test harness reuses x.
    out = pl.pallas_call(
        _scale_kernel,
        out_shape=jax.ShapeDtypeStruct((R, HW), x.dtype),
        grid=grid,
        in_specs=[pl.BlockSpec((rt, ht), lambda i, j: (i, j)),
                  pl.BlockSpec((rt, 1), lambda i, j: (i, 0))],
        out_specs=pl.BlockSpec((rt, ht), lambda i, j: (i, j)),
        compiler_params=pltpu.CompilerParams(
            dimension_semantics=("parallel", "parallel")),
    )(xf, gate)

    return out.reshape(B, C, H, W)


# ---------------------------------------------------------------------------
# Pure-JAX reference (mirrors the PyTorch forward)
# ---------------------------------------------------------------------------

def eca_reference(x, conv_weight, k_size=3):
    B, C, H, W = x.shape
    pad = (k_size - 1) // 2
    w = conv_weight.reshape(-1).astype(jnp.float32)
    y = jnp.mean(x.astype(jnp.float32), axis=(2, 3))             # (B, C)
    ypad = jnp.pad(y, ((0, 0), (pad, pad)))
    conv = sum(w[j] * ypad[:, j:j + C] for j in range(k_size))   # (B, C)
    gate = jax.nn.sigmoid(conv)
    return (x.astype(jnp.float32) * gate[:, :, None, None]).astype(x.dtype)


if __name__ == "__main__":
    key = jax.random.PRNGKey(0)
    kx, kw = jax.random.split(key)

    B, C, H, W = 2, 4, 16, 16
    k_size = 3

    x = jax.random.normal(kx, (B, C, H, W), dtype=jnp.float32)

    # Deterministic Conv1d weight, shape (out=1, in=1, k), PyTorch-like uniform init.
    bound = 1.0 / (1 * k_size) ** 0.5
    conv_weight = jax.random.uniform(
        kw, (1, 1, k_size), minval=-bound, maxval=bound, dtype=jnp.float32)

    # float32 path
    out = eca_forward(x, conv_weight, k_size=k_size)
    out = jax.block_until_ready(out)
    ref = eca_reference(x, conv_weight, k_size=k_size)
    assert out.shape == (B, C, H, W)
    assert out.dtype == x.dtype
    assert jnp.allclose(out, ref, atol=1e-5, rtol=1e-5)

    # bfloat16 path (native-dtype memory traffic; output dtype preserved)
    x_bf16 = x.astype(jnp.bfloat16)
    out_bf16 = jax.block_until_ready(eca_forward(x_bf16, conv_weight, k_size=k_size))
    ref_bf16 = eca_reference(x_bf16, conv_weight, k_size=k_size)
    assert out_bf16.dtype == jnp.bfloat16
    assert jnp.allclose(out_bf16.astype(jnp.float32),
                        ref_bf16.astype(jnp.float32), atol=2e-2, rtol=2e-2)

    print("KERNEL_OK")
</pallas_src>

<mosaic_0001>
module attributes {stable_mosaic.version = 11 : i64} {
  func.func @_pool_kernel(%arg0: i32, %arg1: i32, %arg2: memref<8x256xf32, #tpu.memory_space<vmem>>, %arg3: memref<8x1xf32, #tpu.memory_space<vmem>>) attributes {dimension_semantics = [#tpu.dimension_semantics<parallel>, #tpu.dimension_semantics<arbitrary>], iteration_bounds = array<i64: 1, 1>, scalar_prefetch = 0 : i64, scratch_operands = 0 : i64, tpu.core_type = #tpu.core_type<tc>, window_params = [{transform_indices = @transform_0, window_bounds = array<i64: 8, 256>}, {transform_indices = @transform_1, window_bounds = array<i64: 8, 1>}]} {
    %c0_i32 = arith.constant 0 : i32
    %0 = arith.cmpi eq, %arg1, %c0_i32 : i32
    %1 = arith.extui %0 : i1 to i32
    %c0_i32_0 = arith.constant 0 : i32
    %2 = arith.cmpi ne, %1, %c0_i32_0 : i32
    scf.if %2 {
      %cst_8 = arith.constant 0.000000e+00 : f32
      %12 = vector.broadcast %cst_8 : f32 to vector<8x1xf32>
      %c0_9 = arith.constant 0 : index
      %c0_10 = arith.constant 0 : index
      %13 = vector.load %arg3[%c0_9, %c0_10] : memref<8x1xf32, #tpu.memory_space<vmem>>, vector<8x1xf32>
      tpu.vector_store %arg3[%c0_9, %c0_10], %12 {strides = array<i32>} : memref<8x1xf32, #tpu.memory_space<vmem>>, vector<8x1xf32>,
    } else {
    }
    %c0 = arith.constant 0 : index
    %c0_1 = arith.constant 0 : index
    %3 = vector.load %arg2[%c0, %c0_1] : memref<8x256xf32, #tpu.memory_space<vmem>>, vector<8x256xf32>
    %c0_2 = arith.constant 0 : index
    %c0_3 = arith.constant 0 : index
    %4 = vector.load %arg3[%c0_2, %c0_3] : memref<8x1xf32, #tpu.memory_space<vmem>>, vector<8x1xf32>
    %cst = arith.constant dense<0.000000e+00> : vector<8xf32>
    %5 = vector.multi_reduction <add>, %3, %cst [1] : vector<8x256xf32> to vector<8xf32>
    %6 = vector.shape_cast %5 : vector<8xf32> to vector<8x1xf32>
    %7 = arith.addf %4, %6 : vector<8x1xf32>
    %c0_4 = arith.constant 0 : index
    %c0_5 = arith.constant 0 : index
    %8 = vector.load %arg3[%c0_4, %c0_5] : memref<8x1xf32, #tpu.memory_space<vmem>>, vector<8x1xf32>
    tpu.vector_store %arg3[%c0_4, %c0_5], %7 {strides = array<i32>} : memref<8x1xf32, #tpu.memory_space<vmem>>, vector<8x1xf32>,
    %c0_i32_6 = arith.constant 0 : i32
    %9 = arith.cmpi eq, %arg1, %c0_i32_6 : i32
    %10 = arith.extui %9 : i1 to i32
    %c0_i32_7 = arith.constant 0 : i32
    %11 = arith.cmpi ne, %10, %c0_i32_7 : i32
    scf.if %11 {
      %c0_8 = arith.constant 0 : index
      %c0_9 = arith.constant 0 : index
      %12 = vector.load %arg3[%c0_8, %c0_9] : memref<8x1xf32, #tpu.memory_space<vmem>>, vector<8x1xf32>
      %cst_10 = arith.constant 3.906250e-03 : f32
      %13 = vector.broadcast %cst_10 : f32 to vector<8x1xf32>
      %14 = arith.mulf %12, %13 : vector<8x1xf32>
      %c0_11 = arith.constant 0 : index
      %c0_12 = arith.constant 0 : index
      %15 = vector.load %arg3[%c0_11, %c0_12] : memref<8x1xf32, #tpu.memory_space<vmem>>, vector<8x1xf32>
      tpu.vector_store %arg3[%c0_11, %c0_12], %14 {strides = array<i32>} : memref<8x1xf32, #tpu.memory_space<vmem>>, vector<8x1xf32>,
    } else {
    }
    return
  }
  func.func @transform_0(%arg0: i32, %arg1: i32) -> (i32, i32) {
    %c0_i32 = arith.constant 0 : i32
    return %arg0, %arg1 : i32, i32
  }
  func.func @transform_1(%arg0: i32, %arg1: i32) -> (i32, i32) {
    %c0_i32 = arith.constant 0 : i32
    %c0_i32_0 = arith.constant 0 : i32
    return %arg0, %c0_i32 : i32, i32
  }
}

</mosaic_0001>

<bundles_post_ra>
// kernel: tpu_custom_call.1
= control target key start
LH: loop header
LB: loop body
LE: loop exit
PB: predicated region body
PF: predicated region fallthrough
CT: control target
= control target key end

     0   :  { %6 = vsyncpa [#allocation3], 0  ;;  %s76_s9 = smov [#allocation2]   ;;  %s106_s0 = inlined_call_operand.hbm [shape: f32[8,256], index: 0, kind: input, shape index: {}]   ;;  %s107_s1 = inlined_call_operand.vmem [shape: f32[8,1], index: 1, kind: output, shape index: {}]  }
   0x1   :  { %s12_s8 = sshll.u32 %s106_s0, 4  ;;  %s14_s10 = sshll.u32 %s76_s9, 4  ;;  %s13_s8 = int_to_ptr.hbm [resolvable:$true] %s12_s8  ;;  %s15_s10 = int_to_ptr.vmem [resolvable:$true] %s14_s10 }
   0x2   :  { %17 = dma.hbm_to_vmem [thread:$0]  %s13_s8, 256, %s15_s10, [#allocation3]  }
   0x3   :  { %74 = dma.done.wait [#allocation3], 256  }
   0x4   :  { %75 = vsyncadd [#allocation3], 4294967040  ;;  %vm26_vm0 = vcmask 7168   ;;  %v77_v0 = vmov 0.0   ;;  %v28_v1 = vld [vmem:[#allocation2] sm:$0xff]  ;;  %v29_v2 = vld [vmem:[#allocation2 + $0x8] sm:$0xff] }
   0x5   :  { %27 = vst.msk [vmem:[%s107_s1] sm:$0xff] %vm26_vm0, %v77_v0  ;;  %v31_v3 = vadd.f32 %v29_v2, %v28_v1 }
   0x7   :  { %32 = vadd.xlane.f32.xlu0 %v31_v3 }
   0xc   :  { %v30_v4 = vld [vmem:[%s107_s1] sm:$0xff] }
  0x7a   :  { %v33_v5 = vpop.xlane.xlu0 %32 }
  0x7b   :  { %v34_v6 = vadd.f32 %v33_v5, %v30_v4 }
  0x7d   :  { %36 = vst.msk [vmem:[%s107_s1] sm:$0xff] %vm26_vm0, %v34_v6 }
  0x84   :  { %v40_v7 = vld [vmem:[%s107_s1] sm:$0xff] }
  0x85   :  { %v41_v8 = vmul.f32 0.00390625, %v40_v7 }
  0x87   :  { %42 = vst.msk [vmem:[%s107_s1] sm:$0xff] %vm26_vm0, %v41_v8 }
  0x88   :  { %47 = vsyncpa [#allocation3], 1 }

</bundles_post_ra>
